<compile_context>
chip_gen: v6e
topology: v6e:2x2x1
jax: 0.10.0
libtpu: 0.0.40
codegen_flags: <defaults>
</compile_context>

<pallas_src>
import math

import jax
import jax.numpy as jnp
import numpy as np
from jax.experimental import pallas as pl
from jax.experimental.pallas import tpu as pltpu

CIN_PAD = 8            # pad the 3 input channels to 8 (zero weights/activations)
KP = 80                # im2col contraction: 9 taps * 8 channels = 72, padded to 80


def _choose_layout(H, W, max_tile_lanes=8192):
    """Pick (wp, tr): padded flat width wp >= W+2 and rows-per-tile tr such that
    tr*wp % 128 == 0 (lane-dense, unmasked output stores), preferring layouts
    whose per-tile lane extent fits `max_tile_lanes` and that waste the fewest
    padded output lanes per image."""
    best = None
    for wp in range(W + 2, W + 2 + 129):
        step = 128 // math.gcd(wp, 128)          # minimal tr with tr*wp % 128 == 0
        tr = max(step, (min(H, max(1, max_tile_lanes // wp)) // step) * step)
        hp = -(-H // tr) * tr                    # rows padded up to a multiple of tr
        over_budget = tr * wp > max_tile_lanes
        key = (over_budget, hp * wp, wp)
        if best is None or key < best[0]:
            best = (key, wp, tr)
    _, wp, tr = best
    return wp, tr


def _make_kernel(wp):
    """Kernel factory closing over the padded flat width wp."""

    def kernel(x_ref, w_ref, b_ref, o_ref, pt_ref):
        # x_ref : (1, 1, CIN_PAD, win) bf16  row-tile window (includes 2-row halo)
        # w_ref : (Cout, KP)           bf16
        # b_ref : (Cout, 1)            f32
        # o_ref : (1, Cout, tr*wp)     bf16  lane extent is a multiple of 128
        # pt_ref: (KP, tr*wp)          bf16  im2col scratch
        mcols = o_ref.shape[2]                           # tr * wp

        def tap_slice(tap):                              # static lane offset
            base = (tap // 3) * wp + (tap % 3)
            return x_ref[0, 0, :, base:base + mcols]     # (CIN_PAD, mcols) bf16

        # Build the im2col patch: 9 taps x 8 channels, written in 16-row pairs so
        # every store is aligned to the bf16 (16,128) VMEM tile.  Rows 72..79 are
        # zeroed (their weights are zero) so the MXU never sees garbage bits.
        for pair in range(5):
            s0 = tap_slice(2 * pair)
            if 2 * pair + 1 < 9:
                s1 = tap_slice(2 * pair + 1)
            else:
                s1 = jnp.zeros_like(s0)
            pt_ref[pair * 16:(pair + 1) * 16, :] = jnp.concatenate([s0, s1], axis=0)

        # One fused MXU matmul (Cout, 80) x (80, tr*wp), f32 accumulation.
        acc = jnp.dot(w_ref[...], pt_ref[...], preferred_element_type=jnp.float32)
        acc = jnp.maximum(acc + b_ref[...], 0.0)         # bias + ReLU (f32)
        o_ref[0] = acc.astype(o_ref.dtype)               # lane-dense bf16 store

    return kernel


def vgg16_forward(x_nchw, w_hwio, bias, *, max_tile_lanes=8192):
    """Conv2d(3, 64, k=3, pad=1) + ReLU (the live forward of the reference VGG16).

    x_nchw: (N, 3, H, W) f32;  w_hwio: (3, 3, 3, 64) (KH,KW,Cin,Cout);  bias: (64,).
    Returns (N, 64, H, W) bf16 (NCHW; bf16 output per the HBM-writeback analysis).
    """
    N, Cin, H, W = x_nchw.shape
    KH, KW, _, Cout = w_hwio.shape
    assert (KH, KW) == (3, 3) and Cin <= CIN_PAD and Cout % 8 == 0

    wp, tr = _choose_layout(H, W, max_tile_lanes)
    hp = -(-H // tr) * tr                  # rows padded to a multiple of tr
    r_tiles = hp // tr
    trwp = tr * wp                         # output lanes per tile (multiple of 128)
    win = trwp + 2 * wp + 2                # input window per tile (with halo)
    lx = (hp + 3) * wp                     # flattened padded image length
    assert trwp % 128 == 0

    # Zero-pad channels 3->8, rows (1 top, hp-H+2 bottom), cols (1 left, rest
    # right), flatten spatial dims, cast to bf16 (halves input DMA bytes).
    x_pad = jnp.pad(x_nchw, ((0, 0), (0, CIN_PAD - Cin),
                             (1, hp - H + 2), (1, wp - 1 - W)))
    x_flat = x_pad.reshape(N, CIN_PAD, lx).astype(jnp.bfloat16)

    # Pre-tiled row windows (each with its halo): every in-kernel tap slice gets
    # a static offset and each grid step DMAs exactly its own window.  The ~3-row
    # halo duplication on the small 8-channel input is negligible next to the
    # 64-channel output traffic.
    x_tiled = jnp.stack(
        [jax.lax.slice_in_dim(x_flat, r * trwp, r * trwp + win, axis=2)
         for r in range(r_tiles)], axis=1)                # (N, R, CIN_PAD, win)

    # Weights: (KH,KW,Cin,Cout) -> (Cout, 9*CIN_PAD) matching the (kh,kw,c) patch
    # row order, then pad K 72 -> 80 with zero rows, bf16.
    w_pad = jnp.pad(w_hwio, ((0, 0), (0, 0), (0, CIN_PAD - Cin), (0, 0)))
    w_flat = jnp.transpose(w_pad, (3, 0, 1, 2)).reshape(Cout, KH * KW * CIN_PAD)
    w_flat = jnp.pad(w_flat, ((0, 0), (0, KP - KH * KW * CIN_PAD))).astype(jnp.bfloat16)
    b2d = bias.reshape(Cout, 1).astype(jnp.float32)

    # Per-step VMEM estimate (double-buffered in/out blocks + scratch + weights),
    # with headroom; stays comfortably inside v7x's 64 MiB physical VMEM.
    vmem_est = (2 * CIN_PAD * win * 2 + 2 * Cout * trwp * 2
                + KP * trwp * 2 + Cout * KP * 2 + Cout * 4)
    vmem_limit = max(32 * 1024 * 1024, int(1.5 * vmem_est))

    out_flat = pl.pallas_call(
        _make_kernel(wp),
        out_shape=jax.ShapeDtypeStruct((N, Cout, hp * wp), jnp.bfloat16),
        grid_spec=pltpu.PrefetchScalarGridSpec(
            num_scalar_prefetch=0,
            grid=(N, r_tiles),                              # (batch, row tiles)
            in_specs=[
                pl.BlockSpec((1, 1, CIN_PAD, win), lambda n, r: (n, r, 0, 0)),
                pl.BlockSpec((Cout, KP), lambda n, r: (0, 0)),
                pl.BlockSpec((Cout, 1), lambda n, r: (0, 0)),
            ],
            out_specs=pl.BlockSpec((1, Cout, trwp), lambda n, r: (n, 0, r)),
            scratch_shapes=[pltpu.VMEM((KP, trwp), jnp.bfloat16)],
        ),
        compiler_params=pltpu.CompilerParams(
            dimension_semantics=("parallel", "parallel"),
            vmem_limit_bytes=vmem_limit),
    )(x_tiled, w_flat, b2d)

    # (N, Cout, hp*wp) -> (N, Cout, hp, wp) -> crop padded rows / junk columns.
    # TODO(synk): a fused consumer should keep the padded (hp, wp) bf16 layout
    # and skip this extra (bf16) HBM pass entirely.
    return out_flat.reshape(N, Cout, hp, wp)[:, :, :H, :W]


def reference_forward(x_nchw, w_hwio, bias):
    """Pure-JAX reference: Conv2d(3, 64, k=3, pad=1) + ReLU in f32."""
    w_oihw = jnp.transpose(w_hwio, (3, 2, 0, 1))
    y = jax.lax.conv_general_dilated(
        x_nchw, w_oihw, window_strides=(1, 1), padding="SAME",
        dimension_numbers=("NCHW", "OIHW", "NCHW"),
        precision=jax.lax.Precision.HIGHEST)
    return jnp.maximum(y + bias[None, :, None, None], 0.0)


if __name__ == "__main__":
    key = jax.random.PRNGKey(0)
    kx, kw, kb = jax.random.split(key, 3)

    # Small, VGG16-consistent shapes: batch=2, in_channels=3, spatial=16.
    x = jax.random.normal(kx, (2, 3, 16, 16), dtype=jnp.float32)
    w = jax.random.normal(kw, (3, 3, 3, 64), dtype=jnp.float32) * 0.1  # (KH,KW,Cin,Cout)
    b = jax.random.normal(kb, (64,), dtype=jnp.float32) * 0.1

    # Reference on the same bf16-rounded operands (the kernel feeds the MXU bf16
    # inputs with f32 accumulation and emits bf16), so tolerances only absorb
    # accumulation order + the final bf16 rounding.
    x_r = x.astype(jnp.bfloat16).astype(jnp.float32)
    w_r = w.astype(jnp.bfloat16).astype(jnp.float32)
    y_ref = jax.block_until_ready(reference_forward(x_r, w_r, b))

    # 1) Default layout (single row tile at this toy size; grid = (N, 1)).
    y1 = jax.block_until_ready(vgg16_forward(x, w, b))
    assert y1.shape == (2, 64, 16, 16), y1.shape
    np.testing.assert_allclose(np.asarray(y1.astype(jnp.float32)),
                               np.asarray(y_ref), rtol=2e-2, atol=2e-2)

    # 2) Force multiple row tiles (grid = (N, 4)) to exercise the row-tiling /
    #    halo path with N > 1 and R > 1.
    y2 = jax.block_until_ready(vgg16_forward(x, w, b, max_tile_lanes=128))
    assert y2.shape == (2, 64, 16, 16), y2.shape
    np.testing.assert_allclose(np.asarray(y2.astype(jnp.float32)),
                               np.asarray(y_ref), rtol=2e-2, atol=2e-2)

    print("KERNEL_OK")
</pallas_src>

<mosaic_0001>
module attributes {stable_mosaic.version = 11 : i64} {
  func.func @kernel(%arg0: i32, %arg1: i32, %arg2: memref<1x1x8x434xbf16, #tpu.memory_space<vmem>>, %arg3: memref<64x80xbf16, #tpu.memory_space<vmem>>, %arg4: memref<64x1xf32, #tpu.memory_space<vmem>>, %arg5: memref<1x64x384xbf16, #tpu.memory_space<vmem>>, %arg6: memref<80x384xbf16, #tpu.memory_space<vmem>>) attributes {dimension_semantics = [#tpu.dimension_semantics<parallel>, #tpu.dimension_semantics<parallel>], iteration_bounds = array<i64: 2, 1>, scalar_prefetch = 0 : i64, scratch_operands = 1 : i64, tpu.core_type = #tpu.core_type<tc>, window_params = [{transform_indices = @transform_0, window_bounds = array<i64: 1, 1, 8, 434>}, {pipeline_mode = #tpu.pipeline_mode<synchronous>, transform_indices = @transform_1, window_bounds = array<i64: 64, 80>}, {pipeline_mode = #tpu.pipeline_mode<synchronous>, transform_indices = @transform_2, window_bounds = array<i64: 64, 1>}, {transform_indices = @transform_3, window_bounds = array<i64: 1, 64, 384>}]} {
    %c0 = arith.constant 0 : index
    %c0_0 = arith.constant 0 : index
    %c0_1 = arith.constant 0 : index
    %c0_2 = arith.constant 0 : index
    %0 = vector.load %arg2[%c0, %c0_0, %c0_1, %c0_2] : memref<1x1x8x434xbf16, #tpu.memory_space<vmem>>, vector<1x1x8x384xbf16>
    %1 = vector.shape_cast %0 : vector<1x1x8x384xbf16> to vector<8x384xbf16>
    %c0_3 = arith.constant 0 : index
    %c0_4 = arith.constant 0 : index
    %c0_5 = arith.constant 0 : index
    %c1 = arith.constant 1 : index
    %2 = vector.load %arg2[%c0_3, %c0_4, %c0_5, %c1] : memref<1x1x8x434xbf16, #tpu.memory_space<vmem>>, vector<1x1x8x384xbf16>
    %3 = vector.shape_cast %2 : vector<1x1x8x384xbf16> to vector<8x384xbf16>
    %4 = tpu.concatenate %1, %3 in 0 : vector<8x384xbf16>, vector<8x384xbf16> -> vector<16x384xbf16>
    %c0_6 = arith.constant 0 : index
    %c0_7 = arith.constant 0 : index
    %5 = vector.load %arg6[%c0_6, %c0_7] : memref<80x384xbf16, #tpu.memory_space<vmem>>, vector<16x384xbf16>
    tpu.vector_store %arg6[%c0_6, %c0_7], %4 {strides = array<i32>} : memref<80x384xbf16, #tpu.memory_space<vmem>>, vector<16x384xbf16>,
    %c0_8 = arith.constant 0 : index
    %c0_9 = arith.constant 0 : index
    %c0_10 = arith.constant 0 : index
    %c2 = arith.constant 2 : index
    %6 = vector.load %arg2[%c0_8, %c0_9, %c0_10, %c2] : memref<1x1x8x434xbf16, #tpu.memory_space<vmem>>, vector<1x1x8x384xbf16>
    %7 = vector.shape_cast %6 : vector<1x1x8x384xbf16> to vector<8x384xbf16>
    %c0_11 = arith.constant 0 : index
    %c0_12 = arith.constant 0 : index
    %c0_13 = arith.constant 0 : index
    %c24 = arith.constant 24 : index
    %8 = vector.load %arg2[%c0_11, %c0_12, %c0_13, %c24] : memref<1x1x8x434xbf16, #tpu.memory_space<vmem>>, vector<1x1x8x384xbf16>
    %9 = vector.shape_cast %8 : vector<1x1x8x384xbf16> to vector<8x384xbf16>
    %10 = tpu.concatenate %7, %9 in 0 : vector<8x384xbf16>, vector<8x384xbf16> -> vector<16x384xbf16>
    %c16 = arith.constant 16 : index
    %c0_14 = arith.constant 0 : index
    %11 = vector.load %arg6[%c16, %c0_14] : memref<80x384xbf16, #tpu.memory_space<vmem>>, vector<16x384xbf16>
    tpu.vector_store %arg6[%c16, %c0_14], %10 {strides = array<i32>} : memref<80x384xbf16, #tpu.memory_space<vmem>>, vector<16x384xbf16>,
    %c0_15 = arith.constant 0 : index
    %c0_16 = arith.constant 0 : index
    %c0_17 = arith.constant 0 : index
    %c25 = arith.constant 25 : index
    %12 = vector.load %arg2[%c0_15, %c0_16, %c0_17, %c25] : memref<1x1x8x434xbf16, #tpu.memory_space<vmem>>, vector<1x1x8x384xbf16>
    %13 = vector.shape_cast %12 : vector<1x1x8x384xbf16> to vector<8x384xbf16>
    %c0_18 = arith.constant 0 : index
    %c0_19 = arith.constant 0 : index
    %c0_20 = arith.constant 0 : index
    %c26 = arith.constant 26 : index
    %14 = vector.load %arg2[%c0_18, %c0_19, %c0_20, %c26] : memref<1x1x8x434xbf16, #tpu.memory_space<vmem>>, vector<1x1x8x384xbf16>
    %15 = vector.shape_cast %14 : vector<1x1x8x384xbf16> to vector<8x384xbf16>
    %16 = tpu.concatenate %13, %15 in 0 : vector<8x384xbf16>, vector<8x384xbf16> -> vector<16x384xbf16>
    %c32 = arith.constant 32 : index
    %c0_21 = arith.constant 0 : index
    %17 = vector.load %arg6[%c32, %c0_21] : memref<80x384xbf16, #tpu.memory_space<vmem>>, vector<16x384xbf16>
    tpu.vector_store %arg6[%c32, %c0_21], %16 {strides = array<i32>} : memref<80x384xbf16, #tpu.memory_space<vmem>>, vector<16x384xbf16>,
    %c0_22 = arith.constant 0 : index
    %c0_23 = arith.constant 0 : index
    %c0_24 = arith.constant 0 : index
    %c48 = arith.constant 48 : index
    %18 = vector.load %arg2[%c0_22, %c0_23, %c0_24, %c48] : memref<1x1x8x434xbf16, #tpu.memory_space<vmem>>, vector<1x1x8x384xbf16>
    %19 = vector.shape_cast %18 : vector<1x1x8x384xbf16> to vector<8x384xbf16>
    %c0_25 = arith.constant 0 : index
    %c0_26 = arith.constant 0 : index
    %c0_27 = arith.constant 0 : index
    %c49 = arith.constant 49 : index
    %20 = vector.load %arg2[%c0_25, %c0_26, %c0_27, %c49] : memref<1x1x8x434xbf16, #tpu.memory_space<vmem>>, vector<1x1x8x384xbf16>
    %21 = vector.shape_cast %20 : vector<1x1x8x384xbf16> to vector<8x384xbf16>
    %22 = tpu.concatenate %19, %21 in 0 : vector<8x384xbf16>, vector<8x384xbf16> -> vector<16x384xbf16>
    %c48_28 = arith.constant 48 : index
    %c0_29 = arith.constant 0 : index
    %23 = vector.load %arg6[%c48_28, %c0_29] : memref<80x384xbf16, #tpu.memory_space<vmem>>, vector<16x384xbf16>
    tpu.vector_store %arg6[%c48_28, %c0_29], %22 {strides = array<i32>} : memref<80x384xbf16, #tpu.memory_space<vmem>>, vector<16x384xbf16>,
    %c0_30 = arith.constant 0 : index
    %c0_31 = arith.constant 0 : index
    %c0_32 = arith.constant 0 : index
    %c50 = arith.constant 50 : index
    %24 = vector.load %arg2[%c0_30, %c0_31, %c0_32, %c50] : memref<1x1x8x434xbf16, #tpu.memory_space<vmem>>, vector<1x1x8x384xbf16>
    %25 = vector.shape_cast %24 : vector<1x1x8x384xbf16> to vector<8x384xbf16>
    %cst = arith.constant 0.000000e+00 : bf16
    %26 = vector.broadcast %cst : bf16 to vector<8x384xbf16>
    %27 = tpu.concatenate %25, %26 in 0 : vector<8x384xbf16>, vector<8x384xbf16> -> vector<16x384xbf16>
    %c64 = arith.constant 64 : index
    %c0_33 = arith.constant 0 : index
    %28 = vector.load %arg6[%c64, %c0_33] : memref<80x384xbf16, #tpu.memory_space<vmem>>, vector<16x384xbf16>
    tpu.vector_store %arg6[%c64, %c0_33], %27 {strides = array<i32>} : memref<80x384xbf16, #tpu.memory_space<vmem>>, vector<16x384xbf16>,
    %c0_34 = arith.constant 0 : index
    %c0_35 = arith.constant 0 : index
    %29 = vector.load %arg3[%c0_34, %c0_35] : memref<64x80xbf16, #tpu.memory_space<vmem>>, vector<64x80xbf16>
    %c0_36 = arith.constant 0 : index
    %c0_37 = arith.constant 0 : index
    %30 = vector.load %arg6[%c0_36, %c0_37] : memref<80x384xbf16, #tpu.memory_space<vmem>>, vector<80x384xbf16>
    %cst_38 = arith.constant dense<0.000000e+00> : vector<64x384xf32>
    %31 = tpu.matmul %29, %30, %cst_38 {dimension_numbers = #tpu.dot_dimension_numbers<[1], [0], [0], [1], [0, 0, 1, 1], [], []>} : vector<64x80xbf16>, vector<80x384xbf16>, vector<64x384xf32> -> vector<64x384xf32>
    %c0_39 = arith.constant 0 : index
    %c0_40 = arith.constant 0 : index
    %32 = vector.load %arg4[%c0_39, %c0_40] : memref<64x1xf32, #tpu.memory_space<vmem>>, vector<64x1xf32>
    %33 = vector.broadcast %32 : vector<64x1xf32> to vector<64x384xf32>
    %34 = arith.addf %31, %33 : vector<64x384xf32>
    %cst_41 = arith.constant 0.000000e+00 : f32
    %35 = vector.broadcast %cst_41 : f32 to vector<64x384xf32>
    %36 = arith.maximumf %34, %35 : vector<64x384xf32>
    %37 = arith.truncf %36 : vector<64x384xf32> to vector<64x384xbf16>
    %c0_42 = arith.constant 0 : index
    %c0_43 = arith.constant 0 : index
    %c0_44 = arith.constant 0 : index
    %38 = vector.load %arg5[%c0_42, %c0_43, %c0_44] : memref<1x64x384xbf16, #tpu.memory_space<vmem>>, vector<1x64x384xbf16>
    %39 = vector.shape_cast %38 : vector<1x64x384xbf16> to vector<64x384xbf16>
    %40 = vector.shape_cast %37 : vector<64x384xbf16> to vector<1x64x384xbf16>
    tpu.vector_store %arg5[%c0_42, %c0_43, %c0_44], %40 {strides = array<i32>} : memref<1x64x384xbf16, #tpu.memory_space<vmem>>, vector<1x64x384xbf16>,
    return
  }
  func.func @transform_0(%arg0: i32, %arg1: i32) -> (i32, i32, i32, i32) {
    %c0_i32 = arith.constant 0 : i32
    %c0_i32_0 = arith.constant 0 : i32
    %c0_i32_1 = arith.constant 0 : i32
    return %arg0, %arg1, %c0_i32, %c0_i32_0 : i32, i32, i32, i32
  }
  func.func @transform_1(%arg0: i32, %arg1: i32) -> (i32, i32) {
    %c0_i32 = arith.constant 0 : i32
    %c0_i32_0 = arith.constant 0 : i32
    %c0_i32_1 = arith.constant 0 : i32
    return %c0_i32, %c0_i32_0 : i32, i32
  }
  func.func @transform_2(%arg0: i32, %arg1: i32) -> (i32, i32) {
    %c0_i32 = arith.constant 0 : i32
    %c0_i32_0 = arith.constant 0 : i32
    %c0_i32_1 = arith.constant 0 : i32
    return %c0_i32, %c0_i32_0 : i32, i32
  }
  func.func @transform_3(%arg0: i32, %arg1: i32) -> (i32, i32, i32) {
    %c0_i32 = arith.constant 0 : i32
    %c0_i32_0 = arith.constant 0 : i32
    return %arg0, %c0_i32, %arg1 : i32, i32, i32
  }
}

</mosaic_0001>

<bundles_post_ra>
// kernel: tpu_custom_call.1
= control target key start
LH: loop header
LB: loop body
LE: loop exit
PB: predicated region body
PF: predicated region fallthrough
CT: control target
= control target key end

     0   :  { %8 = vsyncpa [#allocation4], 0  ;;  %s1736_s0 = inlined_call_operand.vmem [shape: bf16[2,1,8,434], index: 0, kind: input, shape index: {}]   ;;  %s1737_s1 = inlined_call_operand.vmem [shape: bf16[64,80], index: 1, kind: input, shape index: {}]   ;;  %s1738_s2 = inlined_call_operand.vmem [shape: f32[64,1], index: 2, kind: input, shape index: {}]   ;;  %s1739_s3 = inlined_call_operand.hbm [shape: bf16[2,64,384], index: 3, kind: output, shape index: {}]  }
   0x1   :  { %10 = vsyncpa [#allocation4 + $0x1], 0  ;;  %s1431_s12 = smov 0   ;;  %s1433_s13 = smov 0  }
   0x2   :  { %s1435_s14 = smov 0   ;;  %s1437_s15 = smov 0  }
   0x3   :  { %s1439_s16 = smov 0   ;;  %s1441_s17 = smov 0  }
   0x4 LB: > { %s1103_s18 = sadd.s32 4294967295, %s1399_s17   ;;  %s1104_s19 = sadd.s32 4294967294, %s1399_s17   ;;  %s1399_s17 = sphi %s1441_s17, %s16_s17   ;;  %s1395_s16 = sphi %s1439_s16, %s1746_s16   ;;  %s1391_s15 = sphi %s1437_s15, %s1745_s15   ;;  %s1387_s14 = sphi %s1435_s14, %s1744_s14   ;;  %s1383_s13 = sphi %s1433_s13, %s1743_s13   ;;  %s1379_s12 = sphi %s1431_s12, %s1742_s12  }
   0x5   : > { %s28_s20 = sadd.s32 1, %s1395_s16  ;;  %s107_s21 = sadd.s32 1, %s1387_s14 }
   0x6   : > { %p30_p0 = scmp.ge.s32.totalorder %s28_s20, 2  ;;  %p117_p1 = scmp.ne.s32.totalorder %s1387_s14, %s1383_s13 }
   0x7   : > { %p118_p2 = scmp.eq.s32.totalorder %s1103_s18, 1  ;;  %p123_p3 = scmp.ne.s32.totalorder %s1383_s13, %s1379_s12 }
   0x8   : > { %s1748_s20 = smov (%p30_p0, %s28_s20), 0  ;;  %p124_p5 = scmp.eq.s32.totalorder %s1104_s19, 1 }
   0x9   : > { %p1471_p4 = por %p118_p2, %p117_p1  ;;  %s102_s23 = ssub.s32 %s1395_s16, %s1748_s20 }
   0xa   : > { %p1107_p6 = scmp.ge.s32.totalorder %s1399_s17, 1  ;;  %p105_p7 = scmp.eq.s32.totalorder %s102_s23, 0 }
   0xb   : > { %p1478_p8 = por %p124_p5, %p123_p3  ;;  %p160_p9 = scmp.lt.s32.totalorder %s1399_s17, 3 }
   0xc   : > { %s1484_s25 = scalar_select %p105_p7, %s1387_s14, %s107_s21  }
   0xd   : > { %p161_p10 = pnand %p1107_p6, %p160_p9 }
   0xe   : > { %p188_p11 = scmp.lt.s32.totalorder (!%p161_p10), %s1391_s15, 1  ;;  %s1401_s4 = smov (!%p161_p10), 127  }
   0xf   : > { %164 = sbr.rel (%p161_p10) target bundleno = 542 (0x21e), region = 32  ;;  %s1402_s5 = smov (!%p161_p10), 106  }
  0x10   : > { %s1403_s6 = smov (!%p161_p10), 78   ;;  %s1404_s7 = smov (!%p161_p10), 80  }
  0x11   : > { %s1405_s8 = smov (!%p161_p10), 103   ;;  %s1406_s9 = smov (!%p161_p10), 126  }
  0x12   : > { %s1408_s10 = smov (!%p161_p10), [#allocation3]  }
  0x13   : > { %s1327_s11 = sshll.u32 (!%p161_p10), %s1408_s10, 4  ;;  %s1328_s11 = int_to_ptr.vmem [resolvable:$false] %s1327_s11 }
  0x14   : > { %s189_s26 = scalar_select %p188_p11, %s1391_s15, 1  ;;  %vm227_vm0 = vcmask 1043456   ;;  %vm223_vm1 = vcmask 1039360   ;;  %vm278_vm2 = vcmask 867328   ;;  %vm544_vm3 = vcmask 637952  }
  0x15   : > { %vm480_vm4 = vcmask 654336   ;;  %vm402_vm5 = vcmask 842752   ;;  %vm324_vm6 = vcmask 1031168  }
  0x16   : > { %s1197_s27 = sshll.u32 %s189_s26, 4 }
  0x17   : > { %s1491_s30 = scalar_lea.vmem %s1736_s0, %s1197_s27  ;;  %s185_s27 = sand.u32 1, %s1383_s13  }
  0x18   : > { %v417_v0 = vld [vmem:[%s1491_s30 + $0x8] sm:$0xff]  ;;  %v416_v1 = vld [vmem:[%s1491_s30] sm:$0xff]  ;;  %s1241_s28 = smul.u32 96, %s185_s27 }
  0x19   : > { %v1495_v2 = vcombine.low %v417_v0, %v417_v0  ;;  %v1497_v3 = vcombine.low %v416_v1, %v416_v1  ;;  %v1499_v4 = vcombine.high %v417_v0, %v417_v0  ;;  %v1503_v5 = vcombine.high %v416_v1, %v416_v1 }
  0x1a   : > { %s1662_s29 = scalar_lea.vmem [#allocation3], %s1241_s28 }
  0x1b   : > { %432 = vrot.lane.b32.xlu1 %v1495_v2, %s1401_s4  ;;  %428 = vrot.lane.b32.xlu0 %v1497_v3, %s1401_s4  ;;  %v512_v6 = vsel %vm227_vm0, %v1495_v2, 0  ;;  %v514_v7 = vsel %vm227_vm0, %v1499_v4, 0  ;;  %v508_v8 = vsel %vm227_vm0, %v1497_v3, 0  ;;  %v510_v9 = vsel %vm227_vm0, %v1503_v5, 0 }
  0x1c   : > { %v1148_v10 = vcombine.low %v512_v6, %v514_v7  ;;  %v1147_v11 = vcombine.low %v508_v8, %v510_v9  ;;  %v1150_v12 = vcombine.high %v512_v6, %v514_v7  ;;  %v1149_v13 = vcombine.high %v508_v8, %v510_v9  ;;  %v1569_v8 = vld [vmem:[%s1737_s1] sm:$0xff]  }
  0x1d   : > { %1233 = vmatprep.mubr.msk.bf16.mxu1 %vm480_vm4, %v1569_v8 }
  0x1f   : > { %434 = vrot.lane.b32.xlu1 %v1499_v4, %s1401_s4  ;;  %430 = vrot.lane.b32.xlu0 %v1503_v5, %s1401_s4 }
  0x23   : > { %352 = vrot.lane.b32.xlu1 %v1503_v5, %s1401_s4  ;;  %350 = vrot.lane.b32.xlu0 %v1497_v3, %s1401_s4 }
  0x27   : > { %356 = vrot.lane.b32.xlu1 %v1499_v4, %s1401_s4  ;;  %354 = vrot.lane.b32.xlu0 %v1495_v2, %s1401_s4 }
  0x2b   : > { %272 = vrot.lane.b32.xlu1 %v1503_v5, %s1402_s5  ;;  %270 = vrot.lane.b32.xlu0 %v1497_v3, %s1402_s5 }
  0x2f   : > { %276 = vrot.lane.b32.xlu1 %v1499_v4, %s1402_s5  ;;  %274 = vrot.lane.b32.xlu0 %v1495_v2, %s1402_s5  ;;  %s1021_s5 = sshll.u32 %s1662_s29, 4  ;;  %s1686_s5 = int_to_ptr.vmem [resolvable:$true] %s1021_s5 }
  0x30   : > { %p1330_p1 = scmp.lt.s32.totalorder %s1686_s5, %s1328_s11 }
  0x33   : > { %533 = vrot.lane.b32.xlu1 %v1148_v10, %s1403_s6  ;;  %531 = vrot.lane.b32.xlu0 %v1147_v11, %s1403_s6  ;;  %v1407_v11 = vmov 0  }
  0x34   : > { %779 = vmatprep.mubr.bf16.mxu0 %v1407_v11  ;;  %1307 = vset.pattern.permute.xlu0 %v1407_v11 }
  0x35   : > { %1308 = vset.pattern.permute.xlu1 %v1407_v11 }
  0x37   : > { %537 = vrot.lane.b32.xlu1 %v1150_v12, %s1403_s6  ;;  %535 = vrot.lane.b32.xlu0 %v1149_v13, %s1403_s6 }
  0x3b   : > { %215 = vrot.lane.b32.xlu0 %v1497_v3, %s1401_s4 }
  0x8d   : > { %v433_v14 = vpop.permute.xlu1 %432  ;;  %v429_v15 = vpop.permute.xlu0 %428 }
  0x91   : > { %v435_v16 = vpop.permute.xlu1 %434  ;;  %v431_v17 = vpop.permute.xlu0 %430 }
  0x92   : > { %v438_v18 = vsel %vm223_vm1, %v433_v14, %v435_v16  ;;  %v450_v19 = vsel %vm227_vm0, %v1499_v4, %v435_v16  ;;  %v436_v20 = vsel %vm223_vm1, %v429_v15, %v431_v17  ;;  %v437_v21 = vsel %vm223_vm1, %v431_v17, %v433_v14 }
  0x93   : > { %v447_v22 = vsel %vm227_vm0, %v1495_v2, %v438_v18  ;;  %v441_v23 = vsel %vm227_vm0, %v1497_v3, %v436_v20  ;;  %v444_v24 = vsel %vm227_vm0, %v1503_v5, %v437_v21  ;;  %v586_v18 = vld [vmem:[%s1738_s2] sm:$0xff]  ;;  %v591_v21 = vld [vmem:[%s1738_s2 + $0x28] sm:$0xff] }
  0x94   : > { %v1140_v25 = vcombine.low %v447_v22, %v450_v19  ;;  %v1139_v26 = vcombine.low %v441_v23, %v444_v24  ;;  %v1142_v29 = vcombine.high %v447_v22, %v450_v19  ;;  %v1141_v31 = vcombine.high %v441_v23, %v444_v24  ;;  %v587_v19 = vld [vmem:[%s1738_s2 + $0x8] sm:$0xff]  ;;  %v590_v20 = vld [vmem:[%s1738_s2 + $0x20] sm:$0xff]  ;;  %v592_v22 = vld [vmem:[%s1738_s2 + $0x30] sm:$0xff] }
  0x95   : > { %v353_v27 = vpop.permute.xlu1 %352  ;;  %v351_v28 = vpop.permute.xlu0 %350  ;;  %v593_v23 = vld [vmem:[%s1738_s2 + $0x38] sm:$0xff] }
  0x96   : > { %469 = vrot.lane.b32.xlu1 %v1140_v25, %s1404_s7  ;;  %467 = vrot.lane.b32.xlu0 %v1139_v26, %s1404_s7  ;;  %v358_v30 = vsel %vm223_vm1, %v351_v28, %v353_v27 }
  0x97   : > { %v363_v37 = vsel %vm227_vm0, %v1497_v3, %v358_v30 }
  0x99   : > { %v357_v32 = vpop.permute.xlu1 %356  ;;  %v355_v33 = vpop.permute.xlu0 %354 }
  0x9a   : > { %v372_v34 = vsel %vm227_vm0, %v1499_v4, %v357_v32  ;;  %v359_v35 = vsel %vm223_vm1, %v353_v27, %v355_v33  ;;  %v360_v36 = vsel %vm223_vm1, %v355_v33, %v357_v32  ;;  %473 = vrot.lane.b32.xlu1 %v1142_v29, %s1404_s7  ;;  %471 = vrot.lane.b32.xlu0 %v1141_v31, %s1404_s7 }
  0x9b   : > { %v366_v38 = vsel %vm227_vm0, %v1503_v5, %v359_v35  ;;  %v369_v39 = vsel %vm227_vm0, %v1495_v2, %v360_v36 }
  0x9c   : > { %v1132_v40 = vcombine.low %v369_v39, %v372_v34  ;;  %v1131_v41 = vcombine.low %v363_v37, %v366_v38  ;;  %v1134_v45 = vcombine.high %v369_v39, %v372_v34  ;;  %v1133_v46 = vcombine.high %v363_v37, %v366_v38 }
  0x9d   : > { %v273_v42 = vpop.permute.xlu1 %272  ;;  %v271_v43 = vpop.permute.xlu0 %270 }
  0x9e   : > { %391 = vrot.lane.b32.xlu1 %v1132_v40, %s1405_s8  ;;  %389 = vrot.lane.b32.xlu0 %v1131_v41, %s1405_s8  ;;  %v279_v44 = vsel %vm278_vm2, %v271_v43, %v273_v42 }
  0x9f   : > { %v284_v52 = vsel %vm227_vm0, %v1497_v3, %v279_v44 }
  0xa1   : > { %v277_v47 = vpop.permute.xlu1 %276  ;;  %v275_v48 = vpop.permute.xlu0 %274 }
  0xa2   : > { %v293_v49 = vsel %vm227_vm0, %v1499_v4, %v277_v47  ;;  %v280_v50 = vsel %vm278_vm2, %v273_v42, %v275_v48  ;;  %v281_v51 = vsel %vm278_vm2, %v275_v48, %v277_v47  ;;  %395 = vrot.lane.b32.xlu1 %v1134_v45, %s1405_s8  ;;  %393 = vrot.lane.b32.xlu0 %v1133_v46, %s1405_s8 }
  0xa3   : > { %v287_v53 = vsel %vm227_vm0, %v1503_v5, %v280_v50  ;;  %v290_v54 = vsel %vm227_vm0, %v1495_v2, %v281_v51 }
  0xa4   : > { %v1124_v55 = vcombine.low %v290_v54, %v293_v49  ;;  %v1123_v56 = vcombine.low %v284_v52, %v287_v53  ;;  %v1126_v61 = vcombine.high %v290_v54, %v293_v49  ;;  %v1125_v62 = vcombine.high %v284_v52, %v287_v53 }
  0xa5   : > { %v534_v57 = vpop.permute.xlu1 %533  ;;  %v532_v58 = vpop.permute.xlu0 %531 }
  0xa6   : > { %312 = vrot.lane.b32.xlu1 %v1124_v55, %s1406_s9  ;;  %310 = vrot.lane.b32.xlu0 %v1123_v56, %s1406_s9  ;;  %v540_v59 = vrot.slane %v534_v57, 4  ;;  %v539_v60 = vrot.slane %v532_v58, 4 }
  0xa8   : > { %v546_v63 = vsel %vm544_vm3, %v534_v57, %v540_v59  ;;  %v543_v0 = vsel %vm227_vm0, %v539_v60, %v540_v59 }
  0xa9   : > { %555 = vst [vmem:[#allocation2 + $0x68] sm:$0xf] %v546_v63  ;;  %v545_v1 = vsel %vm544_vm3, %v532_v58, %v543_v0  ;;  %v538_v6 = vpop.permute.xlu1 %537  ;;  %v536_v7 = vpop.permute.xlu0 %535 }
  0xaa   : > { %316 = vrot.lane.b32.xlu1 %v1126_v61, %s1406_s9  ;;  %314 = vrot.lane.b32.xlu0 %v1125_v62, %s1406_s9  ;;  %v542_v9 = vrot.slane %v538_v6, 4  ;;  %v541_v10 = vrot.slane %v536_v7, 4  ;;  %s1323_s9 = scalar_lea.vmem %s1686_s5, 1536 }
  0xab   : > { %p1324_p12 = scmp.ne.s32.totalorder %s1686_s5, %s1323_s9 }
  0xac   : > { %v549_v12 = vsel %vm544_vm3, %v538_v6, %v542_v9  ;;  %v547_v13 = vsel %vm227_vm0, %v541_v10, %v542_v9 }
  0xad   : > { %557 = vst [vmem:[#allocation2 + $0x74] sm:$0xf] %v549_v12  ;;  %v548_v14 = vsel %vm544_vm3, %v536_v7, %v547_v13  ;;  %v1609_v24 = vpop.permute.xlu0 %215  ;;  %p1325_p13 = pnand %p1324_p12, %p1471_p4 }
  0xae   : > { %217 = vrot.lane.b32.xlu1 %v1503_v5, %s1401_s4  ;;  %219 = vrot.lane.b32.xlu0 %v1495_v2, %s1401_s4  ;;  %v1168_v15 = vcombine.high %v545_v1, %v548_v14  ;;  %v1167_v16 = vcombine.low %v545_v1, %v548_v14  ;;  %v588_v2 = vld [vmem:[%s1738_s2 + $0x10] sm:$0xff] }
  0xaf   : > { %p1326_p0 = pneg %p1325_p13 }
  0xb0   : > { %753 = vmatprep.subr.bf16.mxu0 %v1168_v15 }
  0xb1   : > { %754 = vmatpush1.bf16.msra.mxu0 %v1167_v16 }
  0xb2   : > { %221 = vrot.lane.b32.xlu1 %v1499_v4, %s1401_s4  ;;  %596 = vperm.xlu0 %1307, %v586_v18   ;;  %v589_v4 = vld [vmem:[%s1738_s2 + $0x18] sm:$0xff]  ;;  %s1242_s4 = smul.u32 1536, %s1391_s15  ;;  %s1691_s15 = scalar_lea.sflag [#allocation4], %s185_s27 }
  0xb4   : > { %v1313_v17 = vld [vmem:[#allocation2 + $0x68] ss:$12 sps:$4 sm:$0xff]   ;;  %s1684_s8 = scalar_lea.hbm %s1739_s3, %s1242_s4 }
  0xb5   : > { %1223 = vmatprep.subr.bf16.mxu1 %v1313_v17 }
  0xb6   : > { %1224 = vmatpush3.bf16.msra.mxu1 %v1313_v17  ;;  %601 = vperm.xlu1 %1308, %v587_v19  }
  0xb7   : > { %611 = vperm.xlu0 %1307, %v589_v4  }
  0xba   : > { %606 = vperm.xlu1 %1308, %v588_v2  }
  0xbb   : > { %621 = vperm.xlu0 %1307, %v591_v21   ;;  %v1316_v21 = vld [vmem:[%s1491_s30 + $0x8] ss:$0 sps:$4 sm:$0xff]   ;;  %s1329_s30 = scalar_lea.vmem %s1328_s11, 3072 }
  0xbc   : > { %p1331_p2 = scmp.lt.s32.totalorder %s1329_s30, %s1323_s9 }
  0xbe   : > { %616 = vperm.xlu1 %1308, %v590_v20   ;;  %p1332_p3 = por %p1331_p2, %p1330_p1 }
  0xbf   : > { %631 = vperm.xlu0 %1307, %v593_v23  }
  0xc0   : > { %p1333_p5 = pnand %p1332_p3, %p1326_p0 }
  0xc2   : > { %626 = vperm.xlu1 %1308, %v592_v22  }
 0x108   : > { %v470_v25 = vpop.permute.xlu1 %469  ;;  %v468_v26 = vpop.permute.xlu0 %467 }
 0x109   : > { %v476_v27 = vrot.slane %v470_v25, 4  ;;  %v475_v28 = vrot.slane %v468_v26, 4 }
 0x10b   : > { %v482_v29 = vsel %vm480_vm4, %v470_v25, %v476_v27  ;;  %v479_v30 = vsel %vm227_vm0, %v475_v28, %v476_v27  ;;  %v1321_v28 = vld [vmem:[%s1737_s1 + $0x10] sm:$0xff]  }
 0x10c   : > { %491 = vst [vmem:[#allocation2 + $0x50] sm:$0xf] %v482_v29  ;;  %v481_v31 = vsel %vm480_vm4, %v468_v26, %v479_v30  ;;  %v474_v32 = vpop.permute.xlu1 %473  ;;  %v472_v33 = vpop.permute.xlu0 %471 }
 0x10d   : > { %v478_v34 = vrot.slane %v474_v32, 4  ;;  %v477_v35 = vrot.slane %v472_v33, 4 }
 0x10f   : > { %v485_v36 = vsel %vm480_vm4, %v474_v32, %v478_v34  ;;  %v483_v37 = vsel %vm227_vm0, %v477_v35, %v478_v34 }
 0x110   : > { %493 = vst [vmem:[#allocation2 + $0x5c] sm:$0xf] %v485_v36  ;;  %v484_v38 = vsel %vm480_vm4, %v472_v33, %v483_v37  ;;  %v392_v39 = vpop.permute.xlu1 %391  ;;  %v390_v40 = vpop.permute.xlu0 %389 }
 0x111   : > { %v398_v41 = vrot.slane %v392_v39, 4  ;;  %v397_v42 = vrot.slane %v390_v40, 4  ;;  %v1165_v43 = vcombine.high %v481_v31, %v484_v38  ;;  %v1164_v44 = vcombine.low %v481_v31, %v484_v38 }
 0x113   : > { %v404_v45 = vsel %vm402_vm5, %v392_v39, %v398_v41  ;;  %v401_v46 = vsel %vm227_vm0, %v397_v42, %v398_v41  ;;  %755 = vmatprep.subr.bf16.mxu0 %v1165_v43 }
 0x114   : > { %413 = vst [vmem:[#allocation2 + $0x38] sm:$0xf] %v404_v45  ;;  %v403_v47 = vsel %vm402_vm5, %v390_v40, %v401_v46  ;;  %v396_v48 = vpop.permute.xlu1 %395  ;;  %v394_v49 = vpop.permute.xlu0 %393  ;;  %756 = vmatpush1.bf16.msra.mxu0 %v1164_v44 }
 0x115   : > { %v400_v50 = vrot.slane %v396_v48, 4  ;;  %v399_v51 = vrot.slane %v394_v49, 4 }
 0x117   : > { %v407_v52 = vsel %vm402_vm5, %v396_v48, %v400_v50  ;;  %v405_v53 = vsel %vm227_vm0, %v399_v51, %v400_v50  ;;  %v1314_v54 = vld [vmem:[#allocation2 + $0x50] ss:$12 sps:$4 sm:$0xff]  }
 0x118   : > { %415 = vst [vmem:[#allocation2 + $0x44] sm:$0xf] %v407_v52  ;;  %v406_v55 = vsel %vm402_vm5, %v394_v49, %v405_v53  ;;  %v313_v56 = vpop.permute.xlu1 %312  ;;  %v311_v57 = vpop.permute.xlu0 %310  ;;  %1225 = vmatprep.subr.bf16.mxu1 %v1314_v54 }
 0x119   : > { %v319_v58 = vrot.slane %v313_v56, 4  ;;  %v318_v59 = vrot.slane %v311_v57, 4  ;;  %v1162_v60 = vcombine.high %v403_v47, %v406_v55  ;;  %v1161_v61 = vcombine.low %v403_v47, %v406_v55  ;;  %1226 = vmatpush3.bf16.msra.mxu1 %v1314_v54 }
 0x11b   : > { %v326_v62 = vsel %vm324_vm6, %v313_v56, %v319_v58  ;;  %v323_v63 = vsel %vm227_vm0, %v318_v59, %v319_v58  ;;  %757 = vmatprep.subr.bf16.mxu0 %v1162_v60 }
 0x11c   : > { %335 = vst [vmem:[#allocation2 + $0x20] sm:$0xf] %v326_v62  ;;  %v325_v0 = vsel %vm324_vm6, %v311_v57, %v323_v63  ;;  %v317_v1 = vpop.permute.xlu1 %316  ;;  %v315_v6 = vpop.permute.xlu0 %314  ;;  %758 = vmatpush1.bf16.msra.mxu0 %v1161_v61 }
 0x11d   : > { %v321_v7 = vrot.slane %v317_v1, 4  ;;  %v320_v9 = vrot.slane %v315_v6, 4 }
 0x11f   : > { %v329_v10 = vsel %vm324_vm6, %v317_v1, %v321_v7  ;;  %v327_v12 = vsel %vm227_vm0, %v320_v9, %v321_v7  ;;  %v1315_v13 = vld [vmem:[#allocation2 + $0x38] ss:$12 sps:$4 sm:$0xff]  }
 0x120   : > { %337 = vst [vmem:[#allocation2 + $0x2c] sm:$0xf] %v329_v10  ;;  %v328_v14 = vsel %vm324_vm6, %v315_v6, %v327_v12  ;;  %v218_v15 = vpop.permute.xlu1 %217  ;;  %v220_v16 = vpop.permute.xlu0 %219  ;;  %1227 = vmatprep.subr.bf16.mxu1 %v1315_v13 }
 0x121   : > { %v224_v17 = vsel %vm223_vm1, %v1609_v24, %v218_v15  ;;  %v225_v18 = vsel %vm223_vm1, %v218_v15, %v220_v16  ;;  %v1159_v19 = vcombine.high %v325_v0, %v328_v14  ;;  %v1158_v2 = vcombine.low %v325_v0, %v328_v14  ;;  %1228 = vmatpush3.bf16.msra.mxu1 %v1315_v13 }
 0x122   : > { %v230_v4 = vsel %vm227_vm0, %v1497_v3, %v224_v17  ;;  %v233_v20 = vsel %vm227_vm0, %v1503_v5, %v225_v18  ;;  %v1320_v3 = vld [vmem:[%s1737_s1 + $0x8] sm:$0xff]  }
 0x123   : > { %759 = vmatprep.subr.bf16.mxu0 %v1159_v19 }
 0x124   : > { %v222_v22 = vpop.permute.xlu1 %221  ;;  %760 = vmatpush1.bf16.msra.mxu0 %v1158_v2 }
 0x125   : > { %v226_v23 = vsel %vm223_vm1, %v220_v16, %v222_v22  ;;  %761 = vmatprep.subr.bf16.mxu0 %v233_v20 }
 0x126   : > { %v236_v24 = vsel %vm227_vm0, %v1316_v21, %v226_v23 }
 0x127   : > { %v1116_v25 = vcombine.low %v236_v24, %v236_v24  ;;  %v1118_v26 = vcombine.high %v236_v24, %v236_v24  ;;  %v1317_v27 = vld [vmem:[#allocation2 + $0x20] ss:$12 sps:$4 sm:$0xff]  }
 0x128   : > { %762 = vmatpush1.bf16.msra.mxu0 %v230_v4  ;;  %1229 = vmatprep.subr.bf16.mxu1 %v1317_v27 }
 0x129   : > { %255 = vst [vmem:[#allocation2 + $0x8] sm:$0xf] %v1116_v25  ;;  %257 = vst [vmem:[#allocation2 + $0x14] sm:$0xf] %v1118_v26  ;;  %1230 = vmatpush3.bf16.msra.mxu1 %v1317_v27 }
 0x12b   : > { %1170 = vmatmul.mubr.msk.bf16.vlgmr.msra.gmra.mxu0 %vm480_vm4, %v1569_v8  ;;  %v1322_v8 = vld [vmem:[%s1737_s1 + $0x18] sm:$0xff]  }
 0x12c   : > { %789 = vmatprep.mubr.bf16.mxu0 %v1407_v11 }
 0x12d   : > { %v597_v29 = vpop.permute.xlu0 %596 }
 0x130   : > { %v1319_v5 = vld [vmem:[#allocation2 + $0x8] ss:$12 sps:$4 sm:$0xff]  }
 0x131   : > { %1231 = vmatprep.subr.bf16.mxu1 %v1319_v5  ;;  %v602_v31 = vpop.permute.xlu1 %601 }
 0x132   : > { %1232 = vmatpush3.bf16.msra.mxu1 %v1319_v5  ;;  %v612_v47 = vpop.permute.xlu0 %611 }
 0x133   : > { %1171 = vmatmul.mubr.msk.bf16.gmra.mxu0 %vm480_vm4, %v1320_v3 }
 0x134   : > { %799 = vmatprep.mubr.bf16.mxu0 %v1407_v11 }
 0x135   : > { %1234 = vmatmul.mubr.msk.bf16.vlgmr.msra.gmra.mxu1 %vm480_vm4, %v1320_v3  ;;  %v607_v40 = vpop.permute.xlu1 %606 }
 0x136   : > { %1237 = vmatprep.mubr.msk.bf16.mxu1 %vm480_vm4, %v1321_v28  ;;  %v622_v7 = vpop.permute.xlu0 %621 }
 0x139   : > { %v617_v51 = vpop.permute.xlu1 %616 }
 0x13b   : > { %1172 = vmatmul.mubr.msk.bf16.gmra.mxu0 %vm480_vm4, %v1321_v28 }
 0x13c   : > { %809 = vmatprep.mubr.bf16.mxu0 %v1407_v11 }
 0x13d   : > { %1238 = vmatmul.mubr.msk.bf16.gmra.mxu1 %vm480_vm4, %v1322_v8  ;;  %v627_v15 = vpop.permute.xlu1 %626 }
 0x143   : > { %1173 = vmatmul.mubr.msk.bf16.gmra.mxu0 %vm480_vm4, %v1322_v8 }
 0x1eb   : > { %v781_v30 = vpop.f32.mrf.mxu0 }
 0x1ec   : > { %v782_v32 = vadd.f32 %v781_v30, %v597_v29 }
 0x1ed   : > { %v783_v33 = vpop.f32.mrf.mxu0 }
 0x1ee   : > { %v784_v34 = vadd.f32 %v783_v33, %v597_v29  ;;  %v885_v36 = vmax.f32 %v782_v32, 0.0  ;;  %v632_v32 = vpop.permute.xlu0 %631 }
 0x1ef   : > { %v785_v35 = vpop.f32.mrf.mxu0 }
 0x1f0   : > { %v886_v37 = vmax.f32 %v784_v34, 0.0  ;;  %v786_v38 = vadd.f32 %v785_v35, %v602_v31 }
 0x1f1   : > { %v787_v39 = vpop.f32.mrf.mxu0 }
 0x1f2   : > { %v1198_v11 = vpack.c.bf16 %v886_v37, %v885_v36  ;;  %v788_v41 = vadd.f32 %v787_v39, %v602_v31  ;;  %v888_v43 = vmax.f32 %v786_v38, 0.0 }
 0x1f3   : > { %v791_v42 = vpop.f32.mrf.mxu0 }
 0x1f4   : > { %989 = vst [vmem:[%s1662_s29] sm:$0xff] %v1198_v11  ;;  %v889_v44 = vmax.f32 %v788_v41, 0.0  ;;  %v792_v45 = vadd.f32 %v791_v42, %v607_v40 }
 0x1f5   : > { %v793_v46 = vpop.f32.mrf.mxu0  ;;  %v1235_v48 = vpop.f32.mrf.mxu1 }
 0x1f6   : > { %v1200_v49 = vpack.c.bf16 %v889_v44, %v888_v43  ;;  %v794_v50 = vadd.f32 %v793_v46, %v607_v40  ;;  %v863_v52 = vadd.f32 %v1235_v48, %v607_v40  ;;  %v891_v55 = vmax.f32 %v792_v45, 0.0 }
 0x1f7   : > { %v795_v53 = vpop.f32.mrf.mxu0  ;;  %v854_v54 = vpop.f32.mrf.mxu1 }
 0x1f8   : > { %991 = vst [vmem:[%s1662_s29 + $0xc] sm:$0xff] %v1200_v49  ;;  %v892_v56 = vmax.f32 %v794_v50, 0.0  ;;  %v796_v57 = vadd.f32 %v795_v53, %v612_v47  ;;  %v855_v58 = vadd.f32 %v854_v54, %v597_v29  ;;  %v893_v59 = vmax.f32 %v863_v52, 0.0 }
 0x1f9   : > { %v797_v60 = vpop.f32.mrf.mxu0  ;;  %v1236_v61 = vpop.f32.mrf.mxu1 }
 0x1fa   : > { %v1202_v62 = vpack.c.bf16 %v892_v56, %v891_v55  ;;  %v798_v63 = vadd.f32 %v797_v60, %v612_v47  ;;  %v887_v0 = vmax.f32 %v855_v58, 0.0  ;;  %v1203_v1 = vpack.c.bf16 %v893_v59, %v893_v59 }
 0x1fb   : > { %v866_v6 = vadd.f32 %v1236_v61, %v612_v47  ;;  %v801_v9 = vpop.f32.mrf.mxu0  ;;  %v857_v10 = vpop.f32.mrf.mxu1  ;;  %v894_v12 = vmax.f32 %v796_v57, 0.0 }
 0x1fc   : > { %993 = vst [vmem:[%s1662_s29 + $0x18] sm:$0xff] %v1202_v62  ;;  %v895_v13 = vmax.f32 %v798_v63, 0.0  ;;  %v802_v14 = vadd.f32 %v801_v9, %v617_v51  ;;  %v1199_v16 = vpack.c.bf16 %v887_v0, %v887_v0  ;;  %994 = vst [vmem:[%s1662_s29 + $0x20] sm:$0xf] %v1203_v1  ;;  %v858_v17 = vadd.f32 %v857_v10, %v602_v31 }
 0x1fd   : > { %v896_v18 = vmax.f32 %v866_v6, 0.0  ;;  %v803_v19 = vpop.f32.mrf.mxu0  ;;  %v1239_v2 = vpop.f32.mrf.mxu1 }
 0x1fe   : > { %v1204_v4 = vpack.c.bf16 %v895_v13, %v894_v12  ;;  %v804_v20 = vadd.f32 %v803_v19, %v617_v51  ;;  %990 = vst [vmem:[%s1662_s29 + $0x8] sm:$0xf] %v1199_v16  ;;  %v890_v21 = vmax.f32 %v858_v17, 0.0  ;;  %v879_v23 = vadd.f32 %v1239_v2, %v627_v15 }
 0x1ff   : > { %v1205_v22 = vpack.c.bf16 %v896_v18, %v896_v18  ;;  %v805_v24 = vpop.f32.mrf.mxu0  ;;  %v870_v25 = vpop.f32.mrf.mxu1  ;;  %v897_v26 = vmax.f32 %v802_v14, 0.0 }
 0x200   : > { %995 = vst [vmem:[%s1662_s29 + $0x24] sm:$0xff] %v1204_v4  ;;  %v898_v27 = vmax.f32 %v804_v20, 0.0  ;;  %v806_v3 = vadd.f32 %v805_v24, %v622_v7  ;;  %v1201_v5 = vpack.c.bf16 %v890_v21, %v890_v21  ;;  %v871_v28 = vadd.f32 %v870_v25, %v617_v51 }
 0x201   : > { %996 = vst [vmem:[%s1662_s29 + $0x2c] sm:$0xf] %v1205_v22  ;;  %v905_v8 = vmax.f32 %v879_v23, 0.0  ;;  %v807_v29 = vpop.f32.mrf.mxu0  ;;  %v1240_v30 = vpop.f32.mrf.mxu1 }
 0x202   : > { %v1206_v31 = vpack.c.bf16 %v898_v27, %v897_v26  ;;  %v808_v33 = vadd.f32 %v807_v29, %v622_v7  ;;  %992 = vst [vmem:[%s1662_s29 + $0x14] sm:$0xf] %v1201_v5  ;;  %v899_v34 = vmax.f32 %v871_v28, 0.0  ;;  %v882_v36 = vadd.f32 %v1240_v30, %v632_v32 }
 0x203   : > { %v1211_v35 = vpack.c.bf16 %v905_v8, %v905_v8  ;;  %v811_v37 = vpop.f32.mrf.mxu0  ;;  %v873_v38 = vpop.f32.mrf.mxu1  ;;  %v900_v39 = vmax.f32 %v806_v3, 0.0 }
 0x204   : > { %997 = vst [vmem:[%s1662_s29 + $0x30] sm:$0xff] %v1206_v31  ;;  %v901_v40 = vmax.f32 %v808_v33, 0.0  ;;  %v812_v11 = vadd.f32 %v811_v37, %v627_v15  ;;  %v1207_v41 = vpack.c.bf16 %v899_v34, %v899_v34  ;;  %v874_v42 = vadd.f32 %v873_v38, %v622_v7 }
 0x205   : > { %1002 = vst [vmem:[%s1662_s29 + $0x50] sm:$0xf] %v1211_v35  ;;  %v908_v43 = vmax.f32 %v882_v36, 0.0  ;;  %v813_v44 = vpop.f32.mrf.mxu0 }
 0x206   : > { %v1208_v45 = vpack.c.bf16 %v901_v40, %v900_v39  ;;  %v814_v46 = vadd.f32 %v813_v44, %v627_v15  ;;  %998 = vst [vmem:[%s1662_s29 + $0x38] sm:$0xf] %v1207_v41  ;;  %v902_v47 = vmax.f32 %v874_v42, 0.0  ;;  %v903_v50 = vmax.f32 %v812_v11, 0.0 }
 0x207   : > { %v1213_v48 = vpack.c.bf16 %v908_v43, %v908_v43  ;;  %v815_v49 = vpop.f32.mrf.mxu0 }
 0x208   : > { %999 = vst [vmem:[%s1662_s29 + $0x3c] sm:$0xff] %v1208_v45  ;;  %v904_v51 = vmax.f32 %v814_v46, 0.0  ;;  %v816_v52 = vadd.f32 %v815_v49, %v632_v32  ;;  %v1209_v53 = vpack.c.bf16 %v902_v47, %v902_v47 }
 0x209   : > { %1004 = vst [vmem:[%s1662_s29 + $0x5c] sm:$0xf] %v1213_v48  ;;  %v817_v54 = vpop.f32.mrf.mxu0 }
 0x20a   : > { %v1210_v55 = vpack.c.bf16 %v904_v51, %v903_v50  ;;  %v818_v56 = vadd.f32 %v817_v54, %v632_v32  ;;  %1000 = vst [vmem:[%s1662_s29 + $0x44] sm:$0xf] %v1209_v53  ;;  %v906_v57 = vmax.f32 %v816_v52, 0.0 }
 0x20c   : > { %1001 = vst [vmem:[%s1662_s29 + $0x48] sm:$0xff] %v1210_v55  ;;  %v907_v58 = vmax.f32 %v818_v56, 0.0 }
 0x20e   : > { %v1212_v59 = vpack.c.bf16 %v907_v58, %v906_v57 }
 0x210   : > { %1003 = vst [vmem:[%s1662_s29 + $0x54] sm:$0xff] %v1212_v59 }
 0x211   : > { %1336 = shalt.err (!%p1333_p5)
}
 0x212   : > { %s1337_s18 = scalar_lea.hbm %s1684_s8, 1536  ;;  %s1341_s23 = scalar_lea.hbm %s1739_s3, 3072 }
 0x213   : > { %p1338_p6 = scmp.ne.s32.totalorder %s1684_s8, %s1337_s18  ;;  %p1342_p10 = scmp.lt.s32.totalorder %s1684_s8, %s1739_s3 }
 0x214   : > { %p1343_p11 = scmp.lt.s32.totalorder %s1341_s23, %s1337_s18 }
 0x215   : > { %p1339_p7 = pnand %p1338_p6, %p1471_p4 }
 0x216   : > { %p1344_p12 = por %p1343_p11, %p1342_p10 }
 0x217   : > { %p1340_p9 = pneg %p1339_p7 }
 0x219   : > { %p1345_p13 = pnand %p1344_p12, %p1340_p9 }
 0x21b   : > { %1348 = shalt.err (!%p1345_p13)
}
 0x21c   : > { %s1409_s28 = smov 192   ;;  %s1410_s29 = smov 12  }
 0x21d   : > { %1243 = dma.vmem_to_hbm [thread:$0]  (%p1471_p4), %s1686_s5, 1536, %s1684_s8, %s1691_s15, %s1409_s28, %s1409_s28, %s1410_s29  }
 0x21e PF: > { %p1249_p0 = scmp.ge.s32.totalorder %s1399_s17, 2  ;;  %s1036_s4 = sand.u32 1, %s1379_s12  }
 0x21f   : > { %s1037_s6 = scalar_lea.sflag [#allocation4], %s1036_s4 }
 0x220   : > { %p1246_p1 = pnand %p1249_p0, %p1478_p8 }
 0x222   : > { %p1247_p2 = pneg %p1246_p1 }
 0x224   : > { %1374 = dma.done.wait (%p1247_p2), %s1037_s6, 1536  }
 0x225   : > { %1376 = vsyncadd (%p1247_p2), %s1037_s6, 4294965760  ;;  %s16_s17 = sadd.s32 1, %s1399_s17   ;;  %s1742_s12 = smov %s1383_s13 }
 0x226   : > { %p13_p3 = scmp.ge.s32.totalorder %s16_s17, 4   ;;  %s1743_s13 = smov %s1387_s14 }
 0x227   : > { %s1744_s14 = smov %s1484_s25  ;;  %s1745_s15 = smov %s1395_s16 }
 0x228   : > { %s1746_s16 = smov %s1748_s20  ;;  %15 = sbr.rel (!%p13_p3) target bundleno = 4 (0x4), region = 67 }
 0x22d   :  { %1042 = vsyncpa [#allocation4], 1 }
 0x22e   :  { %1044 = vsyncpa [#allocation4 + $0x1], 1 }

</bundles_post_ra>
